<compile_context>
chip_gen: v7x
topology: tpu7x:2x2x1
jax: 0.10.0
libtpu: 0.0.40
codegen_flags: <defaults>
</compile_context>

<pallas_src>
import math

import jax
import jax.numpy as jnp
from jax.experimental import pallas as pl
from jax.experimental.pallas import tpu as pltpu

MASK_VALUE = -1000000.0  # same constant PyTorch's masked_softmax uses


# ------------------------------- kernel body ---------------------------------
def _make_attention_kernel(*, masked, k_tile, mxu_dtype):
    """Online-softmax (flash) attention body for grid = (batch_groups, key_tiles)."""

    def kernel(*refs):
        if masked:
            q_ref, k_ref, v_ref, valid_ref, o_ref, m_sc, l_sc, acc_sc = refs
        else:
            q_ref, k_ref, v_ref, o_ref, m_sc, l_sc, acc_sc = refs

        kv = pl.program_id(1)

        @pl.when(kv == 0)
        def _init():
            m_sc[...] = jnp.full_like(m_sc, -jnp.inf)
            l_sc[...] = jnp.zeros_like(l_sc)
            acc_sc[...] = jnp.zeros_like(acc_sc)

        d = q_ref.shape[-1]
        scale = 1.0 / math.sqrt(d)

        # Fold 1/sqrt(d) into Q (Sq*D muls instead of Sq*TSk per key step).
        q = (q_ref[...] * scale).astype(q_ref.dtype)
        k = k_ref[...]
        v = v_ref[...]
        if mxu_dtype is not None:  # optional native-MXU operands; f32 accumulation kept
            q = q.astype(mxu_dtype)
            k = k.astype(mxu_dtype)
            v = v.astype(mxu_dtype)

        # Q @ K^T: contract the LAST dims of both operands (trans_b on the MXU,
        # no XLU transpose), accumulate in f32.
        s = jax.lax.dot_general(
            q, k,
            dimension_numbers=(((2,), (2,)), ((0,), (0,))),
            preferred_element_type=jnp.float32,
        )  # (G, Sq, TSk) f32

        if masked:
            # One lane-row iota (1,1,TSk); broadcasts against valid (G,Sq,1) in the
            # compare/select instead of materializing a score-sized iota tensor.
            col = kv * k_tile + jax.lax.broadcasted_iota(jnp.int32, (1, 1, k_tile), 2)
            s = jnp.where(col >= valid_ref[...], jnp.float32(MASK_VALUE), s)

        # Online softmax update (all f32: v5e has no bf16 VPU/EUP).
        # Fully-masked rows (valid_length==0) stay at MASK_VALUE and yield a uniform
        # average of V, matching PyTorch's -1e6 masked_softmax behavior.
        m_prev = m_sc[...]
        m_new = jnp.maximum(m_prev, jnp.max(s, axis=-1, keepdims=True))
        alpha = jnp.exp(m_prev - m_new)
        p = jnp.exp(s - m_new)
        l_sc[...] = alpha * l_sc[...] + jnp.sum(p, axis=-1, keepdims=True)
        acc_sc[...] = alpha * acc_sc[...] + jax.lax.dot_general(
            p.astype(v.dtype), v,
            dimension_numbers=(((2,), (1,)), ((0,), (0,))),
            preferred_element_type=jnp.float32,
        )
        m_sc[...] = m_new

        # TODO(synk): nn.Dropout on the attention weights is an identity here
        # (inference / p=0); a training path needs pltpu.prng_seed + prng_random_bits.

        @pl.when(kv == pl.num_programs(1) - 1)
        def _finalize():
            # Exact reciprocal on the tiny (G,Sq,1) normalizer keeps numerical
            # parity with the PyTorch reference at negligible cost.
            o_ref[...] = (acc_sc[...] * pl.reciprocal(l_sc[...], approx=False)
                          ).astype(o_ref.dtype)

    return kernel


# ----------------------------- valid_length prep ------------------------------
def _build_valid(valid_length, B, Sq, Sk):
    """masked_softmax's valid_length expansion -> (B, Sq, 1) int32, clamped to Sk."""
    v = valid_length.astype(jnp.int32)
    if v.ndim == 1:                         # (B,): same length for every query row
        v = jnp.broadcast_to(v[:, None], (B, Sq))
    else:                                   # (B, Sq): per-row lengths
        v = v.reshape(B, Sq)
    return jnp.minimum(v, Sk).reshape(B, Sq, 1)


# ------------------------------ tile selection --------------------------------
def _vmem_capacity_bytes():
    """Generation-aware VMEM capacity (128 MiB v5e/v6e, 64 MiB per-TC on v7x)."""
    try:
        info = pltpu.get_tpu_info()
        for attr in ("vmem_capacity_bytes", "vmem_size_bytes", "vmem_bytes"):
            cap = getattr(info, attr, None)
            if cap:
                return int(cap)
    except Exception:
        pass
    return 64 * 1024 * 1024                 # conservative default (v7x per-TC VMEM)


def _per_step_bytes(G, TSk, Sq, D, itemsize):
    io = G * (2 * Sq * D + 2 * TSk * D) * itemsize + G * Sq * 4    # Q,out,K,V,valid blocks
    interm = G * (2 * Sq * TSk + Sq * D + 2 * Sq) * 4              # scores/p f32 + acc + m/l
    return 2 * io + interm                                         # x2: double-buffered I/O


def _choose_tiles(B, Sq, Sk, D, itemsize, budget, max_k_tile=512):
    """Pick (G, TSk): a key-axis tile that caps the working set independently of Sk,
    then the largest batch group fitting the budget while keeping >= 2 batch grid
    steps (v7x dual-TensorCore sharding + DMA/compute overlap)."""
    def fits(G, TSk):
        return _per_step_bytes(G, TSk, Sq, D, itemsize) <= budget

    # Key tile: full Sk if small enough, else the largest multiple-of-8 divisor of
    # Sk (clean tiles -> no ragged tail to mask) that fits at G=1.
    if Sk <= max_k_tile and fits(1, Sk):
        TSk = Sk
    else:
        divisors = [t for t in range(min(Sk, max_k_tile), 7, -1)
                    if Sk % t == 0 and t % 8 == 0]
        TSk = Sk
        for t in divisors:
            if fits(1, t):
                TSk = t
                break
        else:
            if divisors:
                TSk = divisors[-1]
            # TODO(synk): shapes with no multiple-of-8 divisor (or still over budget)
            # would need a ragged last key tile with explicit tail masking.

    max_G = B if B < 2 else max(1, B // 2)   # keep >= 2 batch steps when B >= 2
    G = 1
    for cand in range(1, max_G + 1):
        if B % cand == 0 and fits(cand, TSk):
            G = cand
    return G, TSk


def _kv_block_spec(block_shape, index_map, num_k_steps):
    # Triple-buffer K/V when there are enough key steps: K/V dominate bytes moved
    # per step and per-block compute is short at small D.
    if num_k_steps >= 3:
        try:
            return pl.BlockSpec(block_shape, index_map, pipeline_mode=pl.Buffered(3))
        except TypeError:
            pass
    return pl.BlockSpec(block_shape, index_map)


# ----------------------------- DotProductAttention ----------------------------
def dot_product_attention(Q, K, V, valid_length=None, *, mxu_dtype=None):
    """out = masked_softmax(Q K^T / sqrt(d), valid_length) @ V.

    mxu_dtype: optionally cast matmul operands (e.g. jnp.bfloat16) for native MXU
    throughput with f32 inputs; softmax statistics / accumulation stay in f32.
    """
    B, Sq, D = Q.shape
    Sk = K.shape[1]
    masked = valid_length is not None

    cap = _vmem_capacity_bytes()
    budget = cap // 2                        # tile against ~50% of physical VMEM
    itemsize = jnp.dtype(Q.dtype).itemsize
    G, TSk = _choose_tiles(B, Sq, Sk, D, itemsize, budget)
    num_batch_steps = B // G
    num_k_steps = pl.cdiv(Sk, TSk)           # TSk divides Sk by construction

    kernel = _make_attention_kernel(masked=masked, k_tile=TSk, mxu_dtype=mxu_dtype)

    in_specs = [
        pl.BlockSpec((G, Sq, D), lambda i, k: (i, 0, 0)),            # Q: resident across k
        _kv_block_spec((G, TSk, D), lambda i, k: (i, k, 0), num_k_steps),   # K
        _kv_block_spec((G, TSk, D), lambda i, k: (i, k, 0), num_k_steps),   # V
    ]
    args = [Q, K, V]
    if masked:
        in_specs.append(pl.BlockSpec((G, Sq, 1), lambda i, k: (i, 0, 0)))
        args.append(_build_valid(valid_length, B, Sq, Sk))

    # TODO(synk): for multi-head use with per-head D < 128, fold head x head_dim into
    # the last axis in the caller -- a lane-dense output is the fast path.
    grid_spec = pltpu.PrefetchScalarGridSpec(
        num_scalar_prefetch=0,
        grid=(num_batch_steps, num_k_steps),
        in_specs=in_specs,
        out_specs=pl.BlockSpec((G, Sq, D), lambda i, k: (i, 0, 0)),  # resident across k
        scratch_shapes=[
            pltpu.VMEM((G, Sq, 1), jnp.float32),   # running max m
            pltpu.VMEM((G, Sq, 1), jnp.float32),   # running denominator l
            pltpu.VMEM((G, Sq, D), jnp.float32),   # running numerator acc
        ],
    )
    return pl.pallas_call(
        kernel,
        out_shape=jax.ShapeDtypeStruct((B, Sq, D), Q.dtype),
        grid_spec=grid_spec,
        compiler_params=pltpu.CompilerParams(
            dimension_semantics=("parallel", "arbitrary"),
            vmem_limit_bytes=int(cap * 3) // 4,
        ),
    )(*args)


# ------------------------------ pure-JAX reference ----------------------------
def reference(Q, K, V, valid_length):
    B, Sq, D = Q.shape
    Sk = K.shape[1]
    scores = jnp.einsum("bqd,bkd->bqk", Q, K) / math.sqrt(D)
    if valid_length is not None:
        valid = _build_valid(valid_length, B, Sq, Sk)        # (B, Sq, 1)
        col = jnp.arange(Sk)[None, None, :]
        scores = jnp.where(col >= valid, MASK_VALUE, scores)
    w = jax.nn.softmax(scores, axis=-1)
    return jnp.einsum("bqk,bkd->bqd", w, V)


if __name__ == "__main__":
    B, Sq, Sk, D = 4, 8, 8, 32   # batch, query len, key len, d_model

    key0 = jax.random.PRNGKey(0)
    kq, kk, kv_, _ = jax.random.split(key0, 4)
    Q = jax.random.normal(kq, (B, Sq, D), jnp.float32)
    K = jax.random.normal(kk, (B, Sk, D), jnp.float32)
    V = jax.random.normal(kv_, (B, Sk, D), jnp.float32)

    valid_1d = jnp.array([5, 8, 3, 1], dtype=jnp.int32)                       # (B,)
    valid_2d = jnp.minimum(                                                    # (B, Sq)
        jnp.arange(1, Sq + 1)[None, :] + jnp.arange(B)[:, None], Sk
    ).astype(jnp.int32)

    for name, vl in (("1d", valid_1d), ("2d", valid_2d), ("none", None)):
        out = jax.block_until_ready(dot_product_attention(Q, K, V, vl))
        ref = reference(Q, K, V, vl)
        assert out.shape == (B, Sq, D), (name, out.shape)
        assert jnp.allclose(out, ref, atol=1e-4, rtol=1e-4), (
            name, float(jnp.max(jnp.abs(out - ref))))

    # bf16-MXU operand path (perf knob for f32 inputs on v5e/v6e/v7x); looser tolerance.
    out_bf16 = jax.block_until_ready(
        dot_product_attention(Q, K, V, valid_1d, mxu_dtype=jnp.bfloat16))
    ref_bf16 = reference(Q, K, V, valid_1d)
    assert jnp.allclose(out_bf16, ref_bf16, atol=5e-2, rtol=5e-2), float(
        jnp.max(jnp.abs(out_bf16 - ref_bf16)))

    print("KERNEL_OK")
</pallas_src>

<mosaic_0001>
module attributes {stable_mosaic.version = 11 : i64} {
  func.func @kernel(%arg0: i32, %arg1: i32, %arg2: memref<2x8x32xf32, #tpu.memory_space<vmem>>, %arg3: memref<2x8x32xf32, #tpu.memory_space<vmem>>, %arg4: memref<2x8x32xf32, #tpu.memory_space<vmem>>, %arg5: memref<2x8x1xi32, #tpu.memory_space<vmem>>, %arg6: memref<2x8x32xf32, #tpu.memory_space<vmem>>, %arg7: memref<2x8x1xf32, #tpu.memory_space<vmem>>, %arg8: memref<2x8x1xf32, #tpu.memory_space<vmem>>, %arg9: memref<2x8x32xf32, #tpu.memory_space<vmem>>) attributes {dimension_semantics = [#tpu.dimension_semantics<parallel>, #tpu.dimension_semantics<arbitrary>], iteration_bounds = array<i64: 2, 1>, scalar_prefetch = 0 : i64, scratch_operands = 3 : i64, tpu.core_type = #tpu.core_type<tc>, window_params = [{transform_indices = @transform_0, window_bounds = array<i64: 2, 8, 32>}, {transform_indices = @transform_1, window_bounds = array<i64: 2, 8, 32>}, {transform_indices = @transform_2, window_bounds = array<i64: 2, 8, 32>}, {transform_indices = @transform_3, window_bounds = array<i64: 2, 8, 1>}, {transform_indices = @transform_4, window_bounds = array<i64: 2, 8, 32>}]} {
    %c0_i32 = arith.constant 0 : i32
    %0 = arith.cmpi eq, %arg1, %c0_i32 : i32
    %1 = arith.extui %0 : i1 to i32
    %c0_i32_0 = arith.constant 0 : i32
    %2 = arith.cmpi ne, %1, %c0_i32_0 : i32
    scf.if %2 {
      %cst_37 = arith.constant 0xFF800000 : f32
      %44 = vector.broadcast %cst_37 : f32 to vector<2x8x1xf32>
      %c0_38 = arith.constant 0 : index
      %c0_39 = arith.constant 0 : index
      %c0_40 = arith.constant 0 : index
      %45 = vector.load %arg7[%c0_38, %c0_39, %c0_40] : memref<2x8x1xf32, #tpu.memory_space<vmem>>, vector<2x8x1xf32>
      tpu.vector_store %arg7[%c0_38, %c0_39, %c0_40], %44 {strides = array<i32>} : memref<2x8x1xf32, #tpu.memory_space<vmem>>, vector<2x8x1xf32>,
      %cst_41 = arith.constant 0.000000e+00 : f32
      %46 = vector.broadcast %cst_41 : f32 to vector<2x8x1xf32>
      %c0_42 = arith.constant 0 : index
      %c0_43 = arith.constant 0 : index
      %c0_44 = arith.constant 0 : index
      %47 = vector.load %arg8[%c0_42, %c0_43, %c0_44] : memref<2x8x1xf32, #tpu.memory_space<vmem>>, vector<2x8x1xf32>
      tpu.vector_store %arg8[%c0_42, %c0_43, %c0_44], %46 {strides = array<i32>} : memref<2x8x1xf32, #tpu.memory_space<vmem>>, vector<2x8x1xf32>,
      %cst_45 = arith.constant 0.000000e+00 : f32
      %48 = vector.broadcast %cst_45 : f32 to vector<2x8x32xf32>
      %c0_46 = arith.constant 0 : index
      %c0_47 = arith.constant 0 : index
      %c0_48 = arith.constant 0 : index
      %49 = vector.load %arg9[%c0_46, %c0_47, %c0_48] : memref<2x8x32xf32, #tpu.memory_space<vmem>>, vector<2x8x32xf32>
      tpu.vector_store %arg9[%c0_46, %c0_47, %c0_48], %48 {strides = array<i32>} : memref<2x8x32xf32, #tpu.memory_space<vmem>>, vector<2x8x32xf32>,
    } else {
    }
    %c0 = arith.constant 0 : index
    %c0_1 = arith.constant 0 : index
    %c0_2 = arith.constant 0 : index
    %3 = vector.load %arg2[%c0, %c0_1, %c0_2] : memref<2x8x32xf32, #tpu.memory_space<vmem>>, vector<2x8x32xf32>
    %cst = arith.constant 0.176776692 : f32
    %4 = vector.broadcast %cst : f32 to vector<2x8x32xf32>
    %5 = arith.mulf %3, %4 : vector<2x8x32xf32>
    %c0_3 = arith.constant 0 : index
    %c0_4 = arith.constant 0 : index
    %c0_5 = arith.constant 0 : index
    %6 = vector.load %arg3[%c0_3, %c0_4, %c0_5] : memref<2x8x32xf32, #tpu.memory_space<vmem>>, vector<2x8x32xf32>
    %c0_6 = arith.constant 0 : index
    %c0_7 = arith.constant 0 : index
    %c0_8 = arith.constant 0 : index
    %7 = vector.load %arg4[%c0_6, %c0_7, %c0_8] : memref<2x8x32xf32, #tpu.memory_space<vmem>>, vector<2x8x32xf32>
    %cst_9 = arith.constant dense<0.000000e+00> : vector<2x8x8xf32>
    %8 = tpu.matmul %5, %6, %cst_9 {dimension_numbers = #tpu.dot_dimension_numbers<[2], [2], [1], [1], [0, 0, 0, 1, 1, 1], [0], [0]>} : vector<2x8x32xf32>, vector<2x8x32xf32>, vector<2x8x8xf32> -> vector<2x8x8xf32>
    %c8_i32 = arith.constant 8 : i32
    %9 = arith.muli %arg1, %c8_i32 : i32
    %10 = tpu.iota {dimensions = array<i32: 2>} : vector<1x1x8xi32>
    %11 = vector.broadcast %9 : i32 to vector<1x1x8xi32>
    %12 = arith.addi %11, %10 : vector<1x1x8xi32>
    %c0_10 = arith.constant 0 : index
    %c0_11 = arith.constant 0 : index
    %c0_12 = arith.constant 0 : index
    %13 = vector.load %arg5[%c0_10, %c0_11, %c0_12] : memref<2x8x1xi32, #tpu.memory_space<vmem>>, vector<2x8x1xi32>
    %14 = vector.broadcast %12 : vector<1x1x8xi32> to vector<2x8x8xi32>
    %15 = vector.broadcast %13 : vector<2x8x1xi32> to vector<2x8x8xi32>
    %16 = arith.cmpi sge, %14, %15 : vector<2x8x8xi32>
    %cst_13 = arith.constant -1.000000e+06 : f32
    %17 = vector.broadcast %cst_13 : f32 to vector<2x8x8xf32>
    %18 = arith.select %16, %17, %8 : vector<2x8x8xi1>, vector<2x8x8xf32>
    %c0_14 = arith.constant 0 : index
    %c0_15 = arith.constant 0 : index
    %c0_16 = arith.constant 0 : index
    %19 = vector.load %arg7[%c0_14, %c0_15, %c0_16] : memref<2x8x1xf32, #tpu.memory_space<vmem>>, vector<2x8x1xf32>
    %cst_17 = arith.constant dense<0xFF800000> : vector<2x8xf32>
    %20 = vector.multi_reduction <maximumf>, %18, %cst_17 [2] : vector<2x8x8xf32> to vector<2x8xf32>
    %21 = vector.shape_cast %20 : vector<2x8xf32> to vector<2x8x1xf32>
    %22 = arith.maximumf %19, %21 : vector<2x8x1xf32>
    %23 = arith.subf %19, %22 : vector<2x8x1xf32>
    %24 = math.exp %23 : vector<2x8x1xf32>
    %25 = vector.broadcast %22 : vector<2x8x1xf32> to vector<2x8x8xf32>
    %26 = arith.subf %18, %25 : vector<2x8x8xf32>
    %27 = math.exp %26 : vector<2x8x8xf32>
    %c0_18 = arith.constant 0 : index
    %c0_19 = arith.constant 0 : index
    %c0_20 = arith.constant 0 : index
    %28 = vector.load %arg8[%c0_18, %c0_19, %c0_20] : memref<2x8x1xf32, #tpu.memory_space<vmem>>, vector<2x8x1xf32>
    %29 = arith.mulf %24, %28 : vector<2x8x1xf32>
    %cst_21 = arith.constant dense<0.000000e+00> : vector<2x8xf32>
    %30 = vector.multi_reduction <add>, %27, %cst_21 [2] : vector<2x8x8xf32> to vector<2x8xf32>
    %31 = vector.shape_cast %30 : vector<2x8xf32> to vector<2x8x1xf32>
    %32 = arith.addf %29, %31 : vector<2x8x1xf32>
    %c0_22 = arith.constant 0 : index
    %c0_23 = arith.constant 0 : index
    %c0_24 = arith.constant 0 : index
    %33 = vector.load %arg8[%c0_22, %c0_23, %c0_24] : memref<2x8x1xf32, #tpu.memory_space<vmem>>, vector<2x8x1xf32>
    tpu.vector_store %arg8[%c0_22, %c0_23, %c0_24], %32 {strides = array<i32>} : memref<2x8x1xf32, #tpu.memory_space<vmem>>, vector<2x8x1xf32>,
    %c0_25 = arith.constant 0 : index
    %c0_26 = arith.constant 0 : index
    %c0_27 = arith.constant 0 : index
    %34 = vector.load %arg9[%c0_25, %c0_26, %c0_27] : memref<2x8x32xf32, #tpu.memory_space<vmem>>, vector<2x8x32xf32>
    %35 = vector.broadcast %24 : vector<2x8x1xf32> to vector<2x8x32xf32>
    %36 = arith.mulf %35, %34 : vector<2x8x32xf32>
    %cst_28 = arith.constant dense<0.000000e+00> : vector<2x8x32xf32>
    %37 = tpu.matmul %27, %7, %cst_28 {dimension_numbers = #tpu.dot_dimension_numbers<[2], [1], [1], [2], [0, 0, 0, 1, 1, 2], [0], [0]>} : vector<2x8x8xf32>, vector<2x8x32xf32>, vector<2x8x32xf32> -> vector<2x8x32xf32>
    %38 = arith.addf %36, %37 : vector<2x8x32xf32>
    %c0_29 = arith.constant 0 : index
    %c0_30 = arith.constant 0 : index
    %c0_31 = arith.constant 0 : index
    %39 = vector.load %arg9[%c0_29, %c0_30, %c0_31] : memref<2x8x32xf32, #tpu.memory_space<vmem>>, vector<2x8x32xf32>
    tpu.vector_store %arg9[%c0_29, %c0_30, %c0_31], %38 {strides = array<i32>} : memref<2x8x32xf32, #tpu.memory_space<vmem>>, vector<2x8x32xf32>,
    %c0_32 = arith.constant 0 : index
    %c0_33 = arith.constant 0 : index
    %c0_34 = arith.constant 0 : index
    %40 = vector.load %arg7[%c0_32, %c0_33, %c0_34] : memref<2x8x1xf32, #tpu.memory_space<vmem>>, vector<2x8x1xf32>
    tpu.vector_store %arg7[%c0_32, %c0_33, %c0_34], %22 {strides = array<i32>} : memref<2x8x1xf32, #tpu.memory_space<vmem>>, vector<2x8x1xf32>,
    %c0_i32_35 = arith.constant 0 : i32
    %41 = arith.cmpi eq, %arg1, %c0_i32_35 : i32
    %42 = arith.extui %41 : i1 to i32
    %c0_i32_36 = arith.constant 0 : i32
    %43 = arith.cmpi ne, %42, %c0_i32_36 : i32
    scf.if %43 {
      %c0_37 = arith.constant 0 : index
      %c0_38 = arith.constant 0 : index
      %c0_39 = arith.constant 0 : index
      %44 = vector.load %arg9[%c0_37, %c0_38, %c0_39] : memref<2x8x32xf32, #tpu.memory_space<vmem>>, vector<2x8x32xf32>
      %c0_40 = arith.constant 0 : index
      %c0_41 = arith.constant 0 : index
      %c0_42 = arith.constant 0 : index
      %45 = vector.load %arg8[%c0_40, %c0_41, %c0_42] : memref<2x8x1xf32, #tpu.memory_space<vmem>>, vector<2x8x1xf32>
      %46 = tpu.reciprocal %45 : vector<2x8x1xf32> -> vector<2x8x1xf32>
      %47 = vector.broadcast %46 : vector<2x8x1xf32> to vector<2x8x32xf32>
      %48 = arith.mulf %44, %47 : vector<2x8x32xf32>
      %c0_43 = arith.constant 0 : index
      %c0_44 = arith.constant 0 : index
      %c0_45 = arith.constant 0 : index
      %49 = vector.load %arg6[%c0_43, %c0_44, %c0_45] : memref<2x8x32xf32, #tpu.memory_space<vmem>>, vector<2x8x32xf32>
      tpu.vector_store %arg6[%c0_43, %c0_44, %c0_45], %48 {strides = array<i32>} : memref<2x8x32xf32, #tpu.memory_space<vmem>>, vector<2x8x32xf32>,
    } else {
    }
    return
  }
  func.func @transform_0(%arg0: i32, %arg1: i32) -> (i32, i32, i32) {
    %c0_i32 = arith.constant 0 : i32
    %c0_i32_0 = arith.constant 0 : i32
    %c0_i32_1 = arith.constant 0 : i32
    return %arg0, %c0_i32, %c0_i32_0 : i32, i32, i32
  }
  func.func @transform_1(%arg0: i32, %arg1: i32) -> (i32, i32, i32) {
    %c0_i32 = arith.constant 0 : i32
    %c0_i32_0 = arith.constant 0 : i32
    return %arg0, %arg1, %c0_i32 : i32, i32, i32
  }
  func.func @transform_2(%arg0: i32, %arg1: i32) -> (i32, i32, i32) {
    %c0_i32 = arith.constant 0 : i32
    %c0_i32_0 = arith.constant 0 : i32
    return %arg0, %arg1, %c0_i32 : i32, i32, i32
  }
  func.func @transform_3(%arg0: i32, %arg1: i32) -> (i32, i32, i32) {
    %c0_i32 = arith.constant 0 : i32
    %c0_i32_0 = arith.constant 0 : i32
    %c0_i32_1 = arith.constant 0 : i32
    return %arg0, %c0_i32, %c0_i32_0 : i32, i32, i32
  }
  func.func @transform_4(%arg0: i32, %arg1: i32) -> (i32, i32, i32) {
    %c0_i32 = arith.constant 0 : i32
    %c0_i32_0 = arith.constant 0 : i32
    %c0_i32_1 = arith.constant 0 : i32
    return %arg0, %c0_i32, %c0_i32_0 : i32, i32, i32
  }
}

</mosaic_0001>

<bundles_post_ra>
// kernel: tpu_custom_call.1
= control target key start
LH: loop header
LB: loop body
LE: loop exit
PB: predicated region body
PF: predicated region fallthrough
CT: control target
= control target key end

     0   :  { %9 = vsyncpa [#allocation6], 0  ;;  %s1507_s0 = inlined_call_operand.vmem [shape: f32[4,8,32], index: 0, kind: input, shape index: {}]   ;;  %s1508_s1 = inlined_call_operand.hbm [shape: f32[4,8,32], index: 1, kind: input, shape index: {}]   ;;  %s1509_s2 = inlined_call_operand.hbm [shape: f32[4,8,32], index: 2, kind: input, shape index: {}]   ;;  %s1510_s3 = inlined_call_operand.vmem [shape: s32[4,8,1], index: 3, kind: input, shape index: {}]   ;;  %s1511_s4 = inlined_call_operand.hbm [shape: f32[4,8,32], index: 4, kind: output, shape index: {}]  }
   0x1   :  { %11 = vsyncpa [#allocation6 + $0x1], 0 }
   0x2   :  { %12 = vsyncpa [#allocation9], 0 }
   0x3   :  { %14 = vsyncpa [#allocation9 + $0x1], 0 }
   0x4   :  { %15 = vsyncpa [#allocation7], 0 }
   0x5   :  { %17 = vsyncpa [#allocation7 + $0x1], 0  ;;  %s1227_s15 = smov 0   ;;  %s1229_s16 = smov 0  }
   0x6   :  { %s1231_s17 = smov 0   ;;  %s1233_s18 = smov 0  }
   0x7   :  { %s1235_s19 = smov 0   ;;  %s1237_s20 = smov 0  }
   0x8 LB: > { %s894_s21 = sadd.s32 4294967295, %s1189_s20   ;;  %s895_s22 = sadd.s32 4294967294, %s1189_s20   ;;  %s1189_s20 = sphi %s1237_s20, %s23_s20   ;;  %s1185_s19 = sphi %s1235_s19, %s1531_s19   ;;  %s1181_s18 = sphi %s1233_s18, %s1530_s18   ;;  %s1177_s17 = sphi %s1231_s17, %s1529_s17   ;;  %s1173_s16 = sphi %s1229_s16, %s1528_s16   ;;  %s1169_s15 = sphi %s1227_s15, %s1527_s15  }
   0x9   : > { %s35_s23 = sadd.s32 1, %s1185_s19  ;;  %s70_s24 = sadd.s32 1, %s1177_s17 }
   0xa   : > { %p37_p0 = scmp.ge.s32.totalorder %s35_s23, 2  ;;  %p77_p1 = scmp.ne.s32.totalorder %s1177_s17, %s1173_s16 }
   0xb   : > { %p78_p2 = scmp.eq.s32.totalorder %s1189_s20, 0  ;;  %p83_p3 = scmp.ne.s32.totalorder %s1173_s16, %s1169_s15 }
   0xc   : > { %s1533_s23 = smov (%p37_p0, %s35_s23), 0  ;;  %p84_p5 = scmp.eq.s32.totalorder %s894_s21, 0 }
   0xd   : > { %p1268_p4 = por %p78_p2, %p77_p1  ;;  %s65_s26 = ssub.s32 %s1185_s19, %s1533_s23 }
   0xe   : > { %p161_p6 = scmp.eq.s32.totalorder %s894_s21, 1  ;;  %p68_p7 = scmp.eq.s32.totalorder %s65_s26, 0 }
   0xf   : > { %p1274_p8 = por %p84_p5, %p83_p3  ;;  %p167_p10 = scmp.eq.s32.totalorder %s895_s22, 1 }
  0x10   : > { %p1278_p9 = por %p161_p6, %p77_p1  ;;  %p971_p13 = scmp.lt.s32.totalorder %s1189_s20, 2 }
  0x11   : > { %s1516_s27 = scalar_select %p1274_p8, 1, 0 }
  0x12   : > { %s1517_s28 = scalar_select %p1278_p9, 1, 0 }
  0x13   : > { %s1283_s29 = scalar_select %p68_p7, %s1177_s17, %s70_s24  }
  0x14   : > { %p1285_p11 = por %p167_p10, %p83_p3  ;;  %s1292_s5 = sand.u32 1, %s1177_s17  }
  0x15   : > { %s898_s6 = sshll.u32 %s1292_s5, 4  ;;  %s923_s7 = sshll.u32 %s1185_s19, 8 }
  0x16   : > { %s1518_s30 = scalar_select %p1285_p11, 1, 0 }
  0x17   : > { %s1301_s10 = scalar_lea.hbm %s1508_s1, %s923_s7  ;;  %s200_s11 = scalar_lea.vmem [#allocation5], %s898_s6 }
  0x18   : > { %s208_s12 = sshll.u32 %s200_s11, 4  ;;  %p1309_p0 = pnand %p971_p13, %p1268_p4  ;;  %s1305_s12 = int_to_ptr.vmem [resolvable:$true] %s208_s12 }
  0x19   : > { %s197_s14 = scalar_lea.sflag [#allocation6], %s1292_s5  ;;  %s1043_s21 = scalar_lea.hbm %s1301_s10, 256 }
  0x1a   : > { %p1044_p2 = scmp.ne.s32.totalorder %s1301_s10, %s1043_s21  ;;  %p1045_p3 = pneg %p1309_p0 }
  0x1b   : > { %s1048_s25 = scalar_lea.hbm %s1508_s1, 512  ;;  %p1049_p4 = scmp.lt.u32.totalorder %s1301_s10, %s1508_s1 }
  0x1c   : > { %p1046_p5 = pnand %p1045_p3, %p1044_p2  ;;  %p1050_p7 = scmp.lt.u32.totalorder %s1048_s25, %s1043_s21 }
  0x1d   : > { %p1052_p13 = scmp.lt.u32.totalorder %s1043_s21, %s1301_s10 }
  0x1e   : > { %p1047_p6 = pneg %p1046_p5  ;;  %p1051_p10 = por %p1050_p7, %p1049_p4 }
  0x20   : > { %p1053_p12 = por %p1052_p13, %p1051_p10 }
  0x22   : > { %p1054_p1 = pnand %p1053_p12, %p1047_p6 }
  0x24   : > { %1057 = shalt.err (!%p1054_p1)
}
  0x25   : > { %s1058_s9 = scalar_lea.vmem %s1305_s12, 256  ;;  %s1191_s11 = smov [#allocation5]  }
  0x26   : > { %p1059_p2 = scmp.ne.s32.totalorder %s1305_s12, %s1058_s9  ;;  %s1063_s22 = sshll.u32 %s1191_s11, 4  ;;  %s1064_s22 = int_to_ptr.vmem [resolvable:$false] %s1063_s22 }
  0x27   : > { %s1065_s24 = scalar_lea.vmem %s1064_s22, 512  ;;  %p1066_p9 = scmp.lt.s32.totalorder %s1305_s12, %s1064_s22 }
  0x28   : > { %p1061_p5 = pnand %p1059_p2, %p1045_p3  ;;  %p1067_p4 = scmp.lt.s32.totalorder %s1065_s24, %s1058_s9 }
  0x2a   : > { %p1062_p11 = pneg %p1061_p5  ;;  %p1068_p7 = por %p1067_p4, %p1066_p9 }
  0x2c   : > { %p1069_p10 = pnand %p1068_p7, %p1062_p11 }
  0x2e   : > { %1072 = shalt.err (!%p1069_p10)
}
  0x2f   : > { %s1513_s21 = smov 128   ;;  %s1193_s25 = smov 8  }
  0x30   : > { %963 = dma.hbm_to_vmem [thread:$0]  (!%p1309_p0), %s1301_s10, 256, %s1305_s12, %s197_s14, %s1513_s21, %s1513_s21, %s1193_s25  }
  0x31   : > { %p247_p9 = scmp.lt.s32.totalorder %s1189_s20, 3  ;;  %s1351_s9 = scalar_lea.hbm %s1509_s2, %s923_s7 }
  0x32   : > { %p1520_p11 = scmp.ge.s32.totalorder %s1189_s20, 1  ;;  %s222_s22 = scalar_lea.vmem [#allocation8], %s898_s6 }
  0x33   : > { %s230_s24 = sshll.u32 %s222_s22, 4  ;;  %s219_s10 = scalar_lea.sflag [#allocation9], %s1292_s5  ;;  %s1361_s24 = int_to_ptr.vmem [resolvable:$true] %s230_s24 }
  0x34   : > { %p1355_p12 = pnand %p1520_p11, %p247_p9  ;;  %s1073_s12 = scalar_lea.hbm %s1351_s9, 256 }
  0x35   : > { %p1074_p1 = scmp.ne.s32.totalorder %s1351_s9, %s1073_s12  ;;  %s1078_s26 = scalar_lea.hbm %s1509_s2, 512 }
  0x36   : > { %p1079_p2 = scmp.lt.u32.totalorder %s1351_s9, %s1509_s2  ;;  %p1080_p5 = scmp.lt.u32.totalorder %s1078_s26, %s1073_s12 }
  0x37   : > { %p1076_p6 = pnand %p1074_p1, %p1045_p3  ;;  %p1082_p7 = scmp.lt.u32.totalorder %s1073_s12, %s1351_s9 }
  0x38   : > { %p1081_p4 = por %p1080_p5, %p1079_p2 }
  0x39   : > { %p1077_p13 = pneg %p1076_p6 }
  0x3a   : > { %p1083_p10 = por %p1082_p7, %p1081_p4 }
  0x3c   : > { %p1084_p9 = pnand %p1083_p10, %p1077_p13 }
  0x3e   : > { %1087 = shalt.err (!%p1084_p9)
}
  0x3f   : > { %s1088_s6 = scalar_lea.vmem %s1361_s24, 256  ;;  %s1194_s22 = smov [#allocation8]  }
  0x40   : > { %p1089_p11 = scmp.ne.s32.totalorder %s1361_s24, %s1088_s6  ;;  %s1093_s7 = sshll.u32 %s1194_s22, 4  ;;  %s1094_s7 = int_to_ptr.vmem [resolvable:$false] %s1093_s7 }
  0x41   : > { %s1095_s21 = scalar_lea.vmem %s1094_s7, 512  ;;  %p1096_p8 = scmp.lt.s32.totalorder %s1361_s24, %s1094_s7 }
  0x42   : > { %p1091_p1 = pnand %p1089_p11, %p1045_p3  ;;  %p1097_p2 = scmp.lt.s32.totalorder %s1095_s21, %s1088_s6 }
  0x44   : > { %p1092_p6 = pneg %p1091_p1  ;;  %p1098_p5 = por %p1097_p2, %p1096_p8 }
  0x46   : > { %p1099_p4 = pnand %p1098_p5, %p1092_p6 }
  0x48   : > { %1102 = shalt.err (!%p1099_p4)
}
  0x49   : > { %s1522_s12 = smov 128   ;;  %251 = sbr.rel (%p1355_p12) target bundleno = 906 (0x38a), region = 36 }
  0x4a   : > { %966 = dma.hbm_to_vmem [thread:$0]  (!%p1309_p0), %s1351_s9, 256, %s1361_s24, %s219_s10, %s1522_s12, %s1522_s12, %s1193_s25  }
  0x4b   : > { %s1395_s14 = sand.u32 (!%p1355_p12), 1, %s1173_s16   ;;  %p1523_p8 = scmp.ne.s32.totalorder (!%p1355_p12), %s1516_s27, 0 }
  0x4c   : > { %s1398_s26 = sshll.u32 (!%p1355_p12), %s1395_s14, 4  ;;  %s254_s13 = scalar_lea.sflag (!%p1355_p12), [#allocation6], %s1395_s14 }
  0x4d   : > { %s257_s8 = scalar_lea.vmem (!%p1355_p12), [#allocation5], %s1398_s26 }
  0x50   : > { %1156 = dma.done.wait (%p1523_p8), %s254_s13, 256  }
  0x51   : > { %1158 = vsyncadd (%p1523_p8), %s254_s13, 4294967040  ;;  %s263_s5 = scalar_lea.sflag [#allocation9], %s1395_s14  ;;  %s266_s25 = scalar_lea.vmem [#allocation8], %s1398_s26 }
  0x52   : > { %1160 = dma.done.wait (%p1523_p8), %s263_s5, 256  }
  0x53   : > { %1162 = vsyncadd (%p1523_p8), %s263_s5, 4294967040  ;;  %vm330_vm0 = vcmask 261120   ;;  %s908_s9 = sshll.u32 %s1181_s18, 1  ;;  %v1195_v0 = vmov 0.0   ;;  %vm1196_vm1 = vmmov 0   ;;  %v1197_v1 = vmov 0  }
  0x54   : > { %934 = vmatprep.subr.mxu0 %v1195_v0  ;;  %939 = vmatprep.subr.mxu1 %v1195_v0  ;;  %331 = vst.msk [vmem:[#allocation4] sm:$0xff] %vm330_vm0, %v1195_v0  ;;  %332 = vst.msk [vmem:[#allocation4 + $0x8] sm:$0xff] %vm330_vm0, %v1195_v0  ;;  %p307_p0 = scmp.lt.s32.totalorder %s908_s9, 3  ;;  %v337_v2 = vld [vmem:[%s257_s8] sm:$0xff]  ;;  %v338_v3 = vld [vmem:[%s257_s8 + $0x8] sm:$0xff]  ;;  %vm325_vm2 = vcmask 7168   ;;  %v495_v11 = vlaneseq }
  0x55   : > { %936 = vmatprep.mubr.msk.f32.mxu0 %vm1196_vm1, %v1195_v0  ;;  %941 = vmatprep.mubr.msk.f32.mxu1 %vm1196_vm1, %v1195_v0  ;;  %v1198_v10 = vmov -inf   ;;  %328 = vst.msk [vmem:[#allocation3] sm:$0xff] %vm325_vm2, %v1195_v0  ;;  %329 = vst.msk [vmem:[#allocation3 + $0x8] sm:$0xff] %vm325_vm2, %v1195_v0  ;;  %vm513_vm4 = vcmask 64512   ;;  %v339_v31 = vld [vmem:[%s266_s25] sm:$0xff]  ;;  %v340_v32 = vld [vmem:[%s266_s25 + $0x8] sm:$0xff] }
  0x56   : > { %s1535_s9 = smov (!%p307_p0, %s908_s9), 3  ;;  %1029 = vset.pattern.permute.xlu0 %v1197_v1  ;;  %1030 = vset.pattern.permute.xlu1 %v1197_v1  ;;  %326 = vst.msk [vmem:[#allocation2] sm:$0xff] %vm325_vm2, %v1198_v10  ;;  %327 = vst.msk [vmem:[#allocation2 + $0x8] sm:$0xff] %vm325_vm2, %v1198_v10  ;;  %v496_v13 = vand.u32 127, %v495_v11  ;;  %s305_s21 = scalar_lea.vmem [#allocation10], %s1398_s26 }
  0x57   : > { %s909_s27 = sshll.u32 %s1535_s9, 3  ;;  %935 = vmatpush3.xpose.msk.msra.mxu0 %vm330_vm0, %v337_v2  ;;  %940 = vmatpush3.xpose.msk.msra.mxu1 %vm330_vm0, %v338_v3  ;;  %s762_s12 = sshll.u32 %s305_s21, 4  ;;  %s1451_s12 = int_to_ptr.vmem [resolvable:$true] %s762_s12 }
  0x58   : > { %s310_s10 = scalar_lea.vmem %s1507_s0, %s909_s27  ;;  %s318_s7 = scalar_lea.vmem %s1510_s3, %s909_s27  ;;  %944 = vmatprep.subr.mxu0 %v1195_v0  ;;  %949 = vmatprep.subr.mxu1 %v1195_v0 }
  0x59   : > { %v333_v4 = vld [vmem:[%s310_s10] sm:$0xff]  ;;  %v334_v6 = vld [vmem:[%s310_s10 + $0x8] sm:$0xff]  ;;  %s925_s13 = sshll.u32 %s1181_s18, 8  ;;  %s749_s26 = scalar_lea.sflag [#allocation7], %s1395_s14 }
  0x5a   : > { %v335_v5 = vmul.f32 0.17677669, %v333_v4  ;;  %v499_v7 = vld [vmem:[%s318_s7] sm:$0xff]  ;;  %v336_v8 = vmul.f32 0.17677669, %v334_v6  ;;  %v500_v9 = vld [vmem:[%s318_s7 + $0x8] sm:$0xff]  ;;  %s1457_s25 = scalar_lea.hbm %s1511_s4, %s925_s13 }
  0x5b   : > { %502 = vperm.xlu0 %1029, %v499_v7   ;;  %v559_v59 = vld [vmem:[#allocation4] sm:$0xff]  ;;  %v560_v62 = vld [vmem:[#allocation4 + $0x8] sm:$0xff]  ;;  %s1103_s9 = scalar_lea.vmem %s1451_s12, 256  ;;  %p1524_p12 = scmp.ne.s32.totalorder %s1517_s28, 0 }
  0x5c   : > { %937 = vmatmul.mubr.msk.f32.vlgmr.msra.gmra.mrb[0].mxu0 %vm330_vm0, %v335_v5  ;;  %942 = vmatmul.mubr.msk.f32.vlgmr.msra.gmra.mrb[0].mxu1 %vm330_vm0, %v336_v8  ;;  %v544_v47 = vld [vmem:[#allocation3] sm:$0xff]  ;;  %v545_v50 = vld [vmem:[#allocation3 + $0x8] sm:$0xff]  ;;  %p1104_p3 = scmp.ne.s32.totalorder %s1451_s12, %s1103_s9  ;;  %s1199_s18 = smov [#allocation10]  }
  0x5d   : > { %946 = vmatprep.mubr.msk.f32.mxu0 %vm1196_vm1, %v1195_v0  ;;  %951 = vmatprep.mubr.msk.f32.mxu1 %vm1196_vm1, %v1195_v0  ;;  %v511_v23 = vld [vmem:[#allocation2] sm:$0xff]  ;;  %v512_v26 = vld [vmem:[#allocation2 + $0x8] sm:$0xff]  ;;  %s1107_s27 = sshll.u32 %s1199_s18, 4  ;;  %s1108_s27 = int_to_ptr.vmem [resolvable:$false] %s1107_s27 }
  0x5e   : > { %945 = vmatpush3.msra.mxu0 %v339_v31  ;;  %950 = vmatpush3.msra.mxu1 %v340_v32  ;;  %p1105_p13 = pnand %p1104_p3, %p1524_p12  ;;  %s1109_s11 = scalar_lea.vmem %s1108_s27, 512 }
  0x5f   : > { %505 = vperm.xlu0 %1029, %v500_v9   ;;  %p1110_p10 = scmp.lt.s32.totalorder %s1451_s12, %s1108_s27  ;;  %p1111_p9 = scmp.lt.s32.totalorder %s1109_s11, %s1103_s9 }
  0x60   : > { %p1106_p7 = pneg %p1105_p13 }
  0x61   : > { %p1112_p11 = por %p1111_p9, %p1110_p10 }
  0x63   : > { %p1113_p1 = pnand %p1112_p11, %p1106_p7 }
  0xda   : > { %v503_v12 = vpop.permute.xlu0 %502 }
  0xdb   : > { %vm507_vm3 = vcmp.ge.s32.totalorder %v496_v13, %v503_v12 }
  0xde   : > { %v506_v14 = vpop.permute.xlu0 %505 }
  0xdf   : > { %vm508_vm5 = vcmp.ge.s32.totalorder %v496_v13, %v506_v14 }
 0x12f   : > { %v414_v15 = vpop.f32.mrb[0].mxu0  ;;  %v490_v16 = vpop.f32.mrb[0].mxu1 }
 0x130   : > { %v509_v17 = vsel %vm507_vm3, -1000000.0, %v414_v15  ;;  %v938_v18 = vpop.f32.mrb[1].mxu0  ;;  %v943_v19 = vpop.f32.mrb[1].mxu1  ;;  %v510_v21 = vsel %vm508_vm5, -1000000.0, %v490_v16 }
 0x131   : > { %v514_v20 = vsel %vm513_vm4, %v509_v17, -inf  ;;  %v517_v22 = vsel %vm513_vm4, %v510_v21, -inf }
 0x132   : > { %515 = vmax.xlane.f32.xlu1 %v514_v20 }
 0x136   : > { %518 = vmax.xlane.f32.xlu1 %v517_v22 }
 0x1bf   : > { %v516_v24 = vpop.xlane.xlu1 %515 }
 0x1c0   : > { %v520_v25 = vmax.f32 %v511_v23, %v516_v24 }
 0x1c2   : > { %v522_v27 = vsub.f32 %v511_v23, %v520_v25  ;;  %723 = vst.msk [vmem:[#allocation2] sm:$0xff] %vm325_vm2, %v520_v25  ;;  %530 = vperm.xlu0 %1029, %v520_v25  }
 0x1c3   : > { %v519_v28 = vpop.xlane.xlu1 %518 }
 0x1c4   : > { %v521_v29 = vmax.f32 %v512_v26, %v519_v28  ;;  %v524_v44 = vmul.f32 1.442695, %v522_v27 }
 0x1c6   : > { %v523_v30 = vsub.f32 %v512_v26, %v521_v29  ;;  %724 = vst.msk [vmem:[#allocation2 + $0x8] sm:$0xff] %vm325_vm2, %v521_v29  ;;  %535 = vperm.xlu1 %1030, %v521_v29  }
 0x1c8   : > { %v526_v43 = vmul.f32 1.442695, %v523_v30 }
 0x241   : > { %v531_v33 = vpop.permute.xlu0 %530 }
 0x242   : > { %v538_v34 = vsub.f32 %v509_v17, %v531_v33 }
 0x244   : > { %v540_v35 = vmul.f32 1.442695, %v538_v34 }
 0x245   : > { %v536_v36 = vpop.permute.xlu1 %535 }
 0x246   : > { %1031 = vpow2.f32 %v540_v35  ;;  %v539_v37 = vsub.f32 %v510_v21, %v536_v36 }
 0x248   : > { %v542_v38 = vmul.f32 1.442695, %v539_v37 }
 0x24a   : > { %1033 = vpow2.f32 %v542_v38 }
 0x24b   : > { %1035 = vpow2.f32 %v526_v43 }
 0x24c   : > { %1037 = vpow2.f32 %v524_v44 }
 0x250   : > { %v1032_v39 = vpop.eup %1031 }
 0x251   : > { %947 = vmatmul.mubr.msk.f32.vlgmr.msra.gmra.mrb[2].mxu0 %vm513_vm4, %v1032_v39  ;;  %v548_v40 = vsel %vm513_vm4, %v1032_v39, 0.0 }
 0x252   : > { %549 = vadd.xlane.f32.xlu0 %v548_v40 }
 0x254   : > { %v1034_v41 = vpop.eup %1033 }
 0x255   : > { %952 = vmatmul.mubr.msk.f32.vlgmr.msra.gmra.mrb[2].mxu1 %vm513_vm4, %v1034_v41  ;;  %v551_v42 = vsel %vm513_vm4, %v1034_v41, 0.0  ;;  %v1036_v45 = vpop.eup %1035 }
 0x256   : > { %552 = vadd.xlane.f32.xlu1 %v551_v42  ;;  %v1038_v46 = vpop.eup %1037  ;;  %v547_v52 = vmul.f32 %v1036_v45, %v545_v50 }
 0x257   : > { %v546_v48 = vmul.f32 %v1038_v46, %v544_v47 }
 0x267   : > { %568 = vperm.xlu1 %1030, %v1036_v45  }
 0x268   : > { %563 = vperm.xlu0 %1029, %v1038_v46  }
 0x2df   : > { %v550_v49 = vpop.xlane.xlu0 %549 }
 0x2e0   : > { %v554_v51 = vadd.f32 %v550_v49, %v546_v48 }
 0x2e2   : > { %557 = vst.msk [vmem:[#allocation3] sm:$0xff] %vm325_vm2, %v554_v51 }
 0x2e3   : > { %v553_v53 = vpop.xlane.xlu1 %552 }
 0x2e4   : > { %v555_v54 = vadd.f32 %v553_v53, %v547_v52 }
 0x2e6   : > { %558 = vst.msk [vmem:[#allocation3 + $0x8] sm:$0xff] %vm325_vm2, %v555_v54 }
 0x2e7   : > { %v564_v60 = vpop.permute.xlu0 %563  ;;  %v569_v63 = vpop.permute.xlu1 %568 }
 0x2e8   : > { %v571_v61 = vmul.f32 %v564_v60, %v559_v59  ;;  %v572_v3 = vmul.f32 %v569_v63, %v560_v62 }
 0x2e9   : > { %v730_v55 = vld [vmem:[#allocation3] sm:$0xff] }
 0x2ea   : > { %1039 = vrcp.f32 %v730_v55 }
 0x2ed   : > { %v731_v56 = vld [vmem:[#allocation3 + $0x8] sm:$0xff] }
 0x2ee   : > { %1041 = vrcp.f32 %v731_v56 }
 0x2f4   : > { %v1040_v57 = vpop.eup %1039 }
 0x2f5   : > { %736 = vperm.xlu0 %1029, %v1040_v57  }
 0x2f8   : > { %v1042_v58 = vpop.eup %1041 }
 0x2f9   : > { %741 = vperm.xlu0 %1029, %v1042_v58  }
 0x324   : > { %v642_v0 = vpop.f32.mrb[2].mxu0 }
 0x325   : > { %v719_v1 = vadd.f32 %v642_v0, %v571_v61  ;;  %v948_v2 = vpop.f32.mrb[3].mxu0 }
 0x327   : > { %721 = vst.msk [vmem:[#allocation4] sm:$0xff] %vm330_vm0, %v719_v1 }
 0x328   : > { %v715_v4 = vpop.f32.mrb[2].mxu1 }
 0x329   : > { %v720_v5 = vadd.f32 %v715_v4, %v572_v3  ;;  %v953_v6 = vpop.f32.mrb[3].mxu1 }
 0x32b   : > { %722 = vst.msk [vmem:[#allocation4 + $0x8] sm:$0xff] %vm330_vm0, %v720_v5 }
 0x32e   : > { %v728_v7 = vld [vmem:[#allocation4] sm:$0xff] }
 0x332   : > { %v729_v10 = vld [vmem:[#allocation4 + $0x8] sm:$0xff] }
 0x374   : > { %v737_v8 = vpop.permute.xlu0 %736 }
 0x375   : > { %v744_v9 = vmul.f32 %v737_v8, %v728_v7 }
 0x377   : > { %746 = vst.msk [vmem:[%s305_s21] sm:$0xff] %vm330_vm0, %v744_v9 }
 0x378   : > { %v742_v11 = vpop.permute.xlu0 %741 }
 0x379   : > { %v745_v12 = vmul.f32 %v742_v11, %v729_v10 }
 0x37b   : > { %747 = vst.msk [vmem:[%s305_s21 + $0x8] sm:$0xff] %vm330_vm0, %v745_v12 }
 0x37c   : > { %1116 = shalt.err (!%p1113_p1)
}
 0x37d   : > { %s1117_s24 = scalar_lea.hbm %s1457_s25, 256  ;;  %s1121_s22 = scalar_lea.hbm %s1511_s4, 512 }
 0x37e   : > { %p1118_p6 = scmp.ne.s32.totalorder %s1457_s25, %s1117_s24  ;;  %p1122_p4 = scmp.lt.u32.totalorder %s1457_s25, %s1511_s4 }
 0x37f   : > { %p1123_p8 = scmp.lt.u32.totalorder %s1121_s22, %s1117_s24  ;;  %p1125_p3 = scmp.lt.u32.totalorder %s1117_s24, %s1457_s25 }
 0x380   : > { %p1119_p2 = pnand %p1118_p6, %p1524_p12 }
 0x381   : > { %p1124_p0 = por %p1123_p8, %p1122_p4 }
 0x382   : > { %p1120_p5 = pneg %p1119_p2 }
 0x383   : > { %p1126_p13 = por %p1125_p3, %p1124_p0 }
 0x385   : > { %p1127_p7 = pnand %p1126_p13, %p1120_p5 }
 0x387   : > { %1130 = shalt.err (!%p1127_p7)
}
 0x388   : > { %s1200_s13 = smov 128   ;;  %s1201_s8 = smov 8  }
 0x389   : > { %958 = dma.vmem_to_hbm [thread:$0]  (%p1524_p12), %s1451_s12, 256, %s1457_s25, %s749_s26, %s1200_s13, %s1200_s13, %s1201_s8  }
 0x38a PF: > { %s777_s5 = sand.u32 1, %s1169_s15   ;;  %p1525_p10 = scmp.ne.s32.totalorder %s1518_s30, 0 }
 0x38b   : > { %p1526_p9 = scmp.ge.s32.totalorder %s1189_s20, 2  ;;  %s778_s9 = scalar_lea.sflag [#allocation7], %s777_s5 }
 0x38d   : > { %p968_p11 = pnand %p1526_p9, %p1525_p10 }
 0x38f   : > { %1164 = dma.done.wait (!%p968_p11), %s778_s9, 256  }
 0x390   : > { %1166 = vsyncadd (!%p968_p11), %s778_s9, 4294967040  ;;  %s23_s20 = sadd.s32 1, %s1189_s20   ;;  %s1527_s15 = smov %s1173_s16 }
 0x391   : > { %p20_p1 = scmp.ge.s32.totalorder %s23_s20, 4   ;;  %s1528_s16 = smov %s1177_s17 }
 0x392   : > { %s1529_s17 = smov %s1283_s29  ;;  %s1530_s18 = smov %s1185_s19 }
 0x393   : > { %s1531_s19 = smov %s1533_s23  ;;  %22 = sbr.rel (!%p20_p1) target bundleno = 8 (0x8), region = 108 }
 0x39a   :  { %783 = vsyncpa [#allocation6], 1 }
 0x39b   :  { %785 = vsyncpa [#allocation6 + $0x1], 1 }
 0x39c   :  { %786 = vsyncpa [#allocation9], 1 }
 0x39d   :  { %788 = vsyncpa [#allocation9 + $0x1], 1 }
 0x39e   :  { %789 = vsyncpa [#allocation7], 1 }
 0x39f   :  { %791 = vsyncpa [#allocation7 + $0x1], 1 }

</bundles_post_ra>
